<compile_context>
chip_gen: v7x
topology: tpu7x:2x2x1
jax: 0.10.0
libtpu: 0.0.40
codegen_flags: <defaults>
</compile_context>

<pallas_src>
import jax
import jax.numpy as jnp
from jax.experimental import pallas as pl
from jax.experimental.pallas import tpu as pltpu


def _round_up(n, m):
    return ((n + m - 1) // m) * m


def shap_head_kernel(x_ref, w1_ref, b1_ref, w2t_ref, b2t_ref, out_ref):
    # x arrives as f32 straight from HBM; cast to bf16 on the VPU (hidden under
    # the tile DMA) instead of paying a separate wrapper-side HBM cast pass.
    x_bf16 = x_ref[...].astype(w1_ref.dtype)

    # Hidden layer: (TB, D) @ (D, H) -> (TB, H), f32 MXU accumulation.
    h = jnp.dot(x_bf16, w1_ref[...], preferred_element_type=jnp.float32)
    h = jnp.maximum(h + b1_ref[...], 0.0)  # f32 epilogue (v5e-friendly)

    # Folded output layer, computed transposed so the last (lane) dim is the
    # large batch tile:  out_T[l, b] = sum_h W2t[l, h] * h[b, h]  -> (L, TB).
    # Kept in f32 (tiny L x H matmul; SHAP values are precision-sensitive).
    # Any XLU transpose Mosaic inserts for this NT contraction rides the
    # otherwise-idle XLU slot — this kernel is HBM/launch-bound, not XLU-bound.
    out_t = jax.lax.dot_general(
        w2t_ref[...],
        h,
        dimension_numbers=(((1,), (1,)), ((), ())),  # contract H with H
        preferred_element_type=jnp.float32,
    )
    out_ref[...] = (out_t + b2t_ref[...]).astype(out_ref.dtype)


def shap_wrapper_forward(x, w1, b1, w2, b2, label_emb, *, block_b=1024,
                         param_dtype=jnp.bfloat16, out_dtype=jnp.float32,
                         transpose_output=True):
    """out[b, l] = einsum('lg,bg->bl', label_emb, relu(x@w1+b1) @ w2 + b2).

    Set out_dtype=jnp.bfloat16 and/or transpose_output=False if the SHAP
    consumer tolerates it (halves writeback / drops one XLA pass).
    """
    B, D = x.shape
    H = w1.shape[1]
    L = label_emb.shape[0]

    # --- Fold the endpoint-embedding einsum into the head's output layer ----
    #   (h @ W2 + b2) @ label_emb.T == h @ (W2 @ label_emb.T) + b2 @ label_emb.T
    # Stored transposed (L, H) / (L, 1) and kept in f32 for the tiny second
    # matmul — precision is free there.
    w2t = (label_emb @ w2.T).astype(jnp.float32)   # (L, H)
    b2t = (label_emb @ b2.T).astype(jnp.float32)   # (L, 1)

    # Weight casts are tiny one-time ops; x stays f32 and is cast in-kernel.
    w1_c = w1.astype(param_dtype)
    b1_c = b1.astype(jnp.float32)

    # Batch tile: multiple of 128 (lane-dense output stores), big enough to
    # amortize the ~0.35 us per-grid-step overhead, but clamped so the grid
    # keeps >= 2 steps whenever B allows it (both v7x TensorCores busy).
    tile = max(128, min(block_b, _round_up(pl.cdiv(B, 2), 128)))
    n_blocks = pl.cdiv(B, tile)  # ragged tail handled by Pallas store masking

    # Advisory cost estimate so XLA schedules the surrounding ops sensibly.
    flops = 2 * B * (D * H + H * L)
    bytes_accessed = (
        B * D * x.dtype.itemsize                      # x read (f32, once)
        + L * B * jnp.dtype(out_dtype).itemsize       # output write
        + D * H * 2 + H * 4 + L * H * 4 + L * 4       # resident weights/biases
    )

    out_t = pl.pallas_call(
        shap_head_kernel,
        out_shape=jax.ShapeDtypeStruct((L, B), out_dtype),
        grid=(n_blocks,),
        in_specs=[
            pl.BlockSpec((tile, D), lambda i: (i, 0)),  # x: pipelined, f32
            pl.BlockSpec((D, H), lambda i: (0, 0)),     # W1: resident (bf16)
            pl.BlockSpec((1, H), lambda i: (0, 0)),     # b1: resident (f32)
            pl.BlockSpec((L, H), lambda i: (0, 0)),     # folded W2t: resident (f32)
            pl.BlockSpec((L, 1), lambda i: (0, 0)),     # folded b2t: resident (f32)
        ],
        out_specs=pl.BlockSpec((L, tile), lambda i: (0, i)),
        compiler_params=pltpu.CompilerParams(
            dimension_semantics=("parallel",),
        ),
        cost_estimate=pl.CostEstimate(
            flops=flops, transcendentals=0, bytes_accessed=bytes_accessed),
    )(x, w1_c, b1_c, w2t, b2t)

    if transpose_output:
        # (L, B) -> (B, L): wrapper-side layout plumbing, cheap in XLA.
        return out_t.T
    return out_t


def reference_forward(x, w1, b1, w2, b2, label_emb):
    h = jnp.maximum(x @ w1 + b1, 0.0)
    logits = h @ w2 + b2
    return jnp.einsum("lg,bg->bl", label_emb, logits)


if __name__ == "__main__":
    # Small, tile-friendly shapes: batch records B, input dim D, hidden H,
    # graph/logit dim G, number of endpoint labels L.  B=256 yields a 2-step
    # batch grid (tile=128), exercising the pipelined / parallel grid path.
    B, D, H, G, L = 256, 32, 64, 128, 16

    key = jax.random.PRNGKey(0)
    kx, k1, kb1, k2, kb2, kl = jax.random.split(key, 6)

    x = jax.random.normal(kx, (B, D), dtype=jnp.float32)
    w1 = jax.random.normal(k1, (D, H), dtype=jnp.float32) * 0.1
    b1 = jax.random.normal(kb1, (1, H), dtype=jnp.float32) * 0.01
    w2 = jax.random.normal(k2, (H, G), dtype=jnp.float32) * 0.1
    b2 = jax.random.normal(kb2, (1, G), dtype=jnp.float32) * 0.01
    label_emb = jax.random.normal(kl, (L, G), dtype=jnp.float32) * 0.1

    out = shap_wrapper_forward(x, w1, b1, w2, b2, label_emb)
    out = jax.block_until_ready(out)

    ref = reference_forward(x, w1, b1, w2, b2, label_emb)
    assert out.shape == (B, L), out.shape
    # bf16 first matmul + f32 second matmul vs a pure-f32 reference: loose tol.
    assert jnp.allclose(out, ref, atol=5e-2, rtol=5e-2), (
        float(jnp.max(jnp.abs(out - ref))))

    # TODO(synk): the real lightning_module.module_dict['head'] is opaque in
    # the original script; a synthetic 2-layer MLP head stands in for it here.

    print("KERNEL_OK")
</pallas_src>

<mosaic_0001>
module attributes {stable_mosaic.version = 11 : i64} {
  func.func @shap_head_kernel(%arg0: i32, %arg1: memref<128x32xf32, #tpu.memory_space<vmem>>, %arg2: memref<32x64xbf16, #tpu.memory_space<vmem>>, %arg3: memref<1x64xf32, #tpu.memory_space<vmem>>, %arg4: memref<16x64xf32, #tpu.memory_space<vmem>>, %arg5: memref<16x1xf32, #tpu.memory_space<vmem>>, %arg6: memref<16x128xf32, #tpu.memory_space<vmem>>) attributes {dimension_semantics = [#tpu.dimension_semantics<parallel>], iteration_bounds = array<i64: 2>, scalar_prefetch = 0 : i64, scratch_operands = 0 : i64, tpu.core_type = #tpu.core_type<tc>, window_params = [{transform_indices = @transform_0, window_bounds = array<i64: 128, 32>}, {pipeline_mode = #tpu.pipeline_mode<synchronous>, transform_indices = @transform_1, window_bounds = array<i64: 32, 64>}, {pipeline_mode = #tpu.pipeline_mode<synchronous>, transform_indices = @transform_2, window_bounds = array<i64: 1, 64>}, {pipeline_mode = #tpu.pipeline_mode<synchronous>, transform_indices = @transform_3, window_bounds = array<i64: 16, 64>}, {pipeline_mode = #tpu.pipeline_mode<synchronous>, transform_indices = @transform_4, window_bounds = array<i64: 16, 1>}, {transform_indices = @transform_5, window_bounds = array<i64: 16, 128>}]} {
    %c0 = arith.constant 0 : index
    %c0_0 = arith.constant 0 : index
    %0 = vector.load %arg1[%c0, %c0_0] : memref<128x32xf32, #tpu.memory_space<vmem>>, vector<128x32xf32>
    %1 = arith.truncf %0 : vector<128x32xf32> to vector<128x32xbf16>
    %c0_1 = arith.constant 0 : index
    %c0_2 = arith.constant 0 : index
    %2 = vector.load %arg2[%c0_1, %c0_2] : memref<32x64xbf16, #tpu.memory_space<vmem>>, vector<32x64xbf16>
    %cst = arith.constant dense<0.000000e+00> : vector<128x64xf32>
    %3 = tpu.matmul %1, %2, %cst {dimension_numbers = #tpu.dot_dimension_numbers<[1], [0], [0], [1], [0, 0, 1, 1], [], []>} : vector<128x32xbf16>, vector<32x64xbf16>, vector<128x64xf32> -> vector<128x64xf32>
    %c0_3 = arith.constant 0 : index
    %c0_4 = arith.constant 0 : index
    %4 = vector.load %arg3[%c0_3, %c0_4] : memref<1x64xf32, #tpu.memory_space<vmem>>, vector<1x64xf32>
    %5 = vector.broadcast %4 : vector<1x64xf32> to vector<128x64xf32>
    %6 = arith.addf %3, %5 : vector<128x64xf32>
    %cst_5 = arith.constant 0.000000e+00 : f32
    %7 = vector.broadcast %cst_5 : f32 to vector<128x64xf32>
    %8 = arith.maximumf %6, %7 : vector<128x64xf32>
    %c0_6 = arith.constant 0 : index
    %c0_7 = arith.constant 0 : index
    %9 = vector.load %arg4[%c0_6, %c0_7] : memref<16x64xf32, #tpu.memory_space<vmem>>, vector<16x64xf32>
    %cst_8 = arith.constant dense<0.000000e+00> : vector<16x128xf32>
    %10 = tpu.matmul %9, %8, %cst_8 {dimension_numbers = #tpu.dot_dimension_numbers<[1], [1], [0], [0], [0, 0, 1, 0], [], []>} : vector<16x64xf32>, vector<128x64xf32>, vector<16x128xf32> -> vector<16x128xf32>
    %c0_9 = arith.constant 0 : index
    %c0_10 = arith.constant 0 : index
    %11 = vector.load %arg5[%c0_9, %c0_10] : memref<16x1xf32, #tpu.memory_space<vmem>>, vector<16x1xf32>
    %12 = vector.broadcast %11 : vector<16x1xf32> to vector<16x128xf32>
    %13 = arith.addf %10, %12 : vector<16x128xf32>
    %c0_11 = arith.constant 0 : index
    %c0_12 = arith.constant 0 : index
    %14 = vector.load %arg6[%c0_11, %c0_12] : memref<16x128xf32, #tpu.memory_space<vmem>>, vector<16x128xf32>
    tpu.vector_store %arg6[%c0_11, %c0_12], %13 {strides = array<i32>} : memref<16x128xf32, #tpu.memory_space<vmem>>, vector<16x128xf32>,
    return
  }
  func.func @transform_0(%arg0: i32) -> (i32, i32) {
    %c0_i32 = arith.constant 0 : i32
    %c0_i32_0 = arith.constant 0 : i32
    return %arg0, %c0_i32 : i32, i32
  }
  func.func @transform_1(%arg0: i32) -> (i32, i32) {
    %c0_i32 = arith.constant 0 : i32
    %c0_i32_0 = arith.constant 0 : i32
    %c0_i32_1 = arith.constant 0 : i32
    return %c0_i32, %c0_i32_0 : i32, i32
  }
  func.func @transform_2(%arg0: i32) -> (i32, i32) {
    %c0_i32 = arith.constant 0 : i32
    %c0_i32_0 = arith.constant 0 : i32
    %c0_i32_1 = arith.constant 0 : i32
    return %c0_i32, %c0_i32_0 : i32, i32
  }
  func.func @transform_3(%arg0: i32) -> (i32, i32) {
    %c0_i32 = arith.constant 0 : i32
    %c0_i32_0 = arith.constant 0 : i32
    %c0_i32_1 = arith.constant 0 : i32
    return %c0_i32, %c0_i32_0 : i32, i32
  }
  func.func @transform_4(%arg0: i32) -> (i32, i32) {
    %c0_i32 = arith.constant 0 : i32
    %c0_i32_0 = arith.constant 0 : i32
    %c0_i32_1 = arith.constant 0 : i32
    return %c0_i32, %c0_i32_0 : i32, i32
  }
  func.func @transform_5(%arg0: i32) -> (i32, i32) {
    %c0_i32 = arith.constant 0 : i32
    %c0_i32_0 = arith.constant 0 : i32
    return %c0_i32, %arg0 : i32, i32
  }
}

</mosaic_0001>

<bundles_post_ra>
// kernel: tpu_custom_call.1
= control target key start
LH: loop header
LB: loop body
LE: loop exit
PB: predicated region body
PF: predicated region fallthrough
CT: control target
= control target key end

     0   :  { %10 = vsyncpa [#allocation3], 0  ;;  %s1137_s0 = inlined_call_operand.vmem [shape: f32[256,32], index: 0, kind: input, shape index: {}]   ;;  %s1138_s1 = inlined_call_operand.vmem [shape: bf16[32,64], index: 1, kind: input, shape index: {}]   ;;  %s1139_s2 = inlined_call_operand.vmem [shape: f32[1,64], index: 2, kind: input, shape index: {}]   ;;  %s1140_s3 = inlined_call_operand.vmem [shape: f32[16,64], index: 3, kind: input, shape index: {}]   ;;  %s1141_s4 = inlined_call_operand.vmem [shape: f32[16,1], index: 4, kind: input, shape index: {}]   ;;  %s1142_s5 = inlined_call_operand.hbm [shape: f32[16,256], index: 5, kind: output, shape index: {}]  }
   0x1   :  { %12 = vsyncpa [#allocation3 + $0x1], 0  ;;  %s948_s18 = smov 0   ;;  %s950_s19 = smov 0  }
   0x2   :  { %s952_s20 = smov 0   ;;  %s954_s21 = smov 0  }
   0x3 LB: > { %s969_s22 = sadd.s32 4294967295, %s911_s21   ;;  %s632_s23 = sadd.s32 4294967294, %s911_s21   ;;  %s911_s21 = sphi %s954_s21, %s1150_s21   ;;  %s907_s20 = sphi %s952_s20, %s1149_s20   ;;  %s903_s19 = sphi %s950_s19, %s1148_s19   ;;  %s899_s18 = sphi %s948_s18, %s1147_s18  }
   0x4   : > { %s973_s24 = sadd.s32 1, %s911_s21   ;;  %s135_s25 = sadd.s32 1, %s907_s20 }
   0x5   : > { %s132_s26 = ssub.s32 %s911_s21, %s973_s24  ;;  %p145_p0 = scmp.ne.s32.totalorder %s907_s20, %s903_s19 }
   0x6   : > { %p133_p1 = scmp.eq.s32.totalorder %s132_s26, 0  ;;  %p146_p2 = scmp.eq.s32.totalorder %s969_s22, 1 }
   0x7   : > { %p151_p3 = scmp.ne.s32.totalorder %s903_s19, %s899_s18  ;;  %p152_p4 = scmp.eq.s32.totalorder %s632_s23, 1 }
   0x8   : > { %s984_s27 = scalar_select %p133_p1, %s907_s20, %s135_s25  }
   0x9   : > { %p986_p5 = por %p146_p2, %p145_p0  ;;  %p990_p6 = por %p152_p4, %p151_p3 }
   0xa   : > { %p635_p7 = scmp.ge.s32.totalorder %s911_s21, 1  ;;  %p191_p8 = scmp.lt.s32.totalorder %s911_s21, 3 }
   0xc   : > { %p192_p9 = pnand %p635_p7, %p191_p8 }
   0xd   : > { %v847_v0 = vld [vmem:[%s1138_s1] sm:$0xff] (!%p192_p9)   ;;  %s637_s7 = sshll.u32 (!%p192_p9), %s969_s22, 4  ;;  %v848_v1 = vld [vmem:[%s1138_s1 + $0x8] sm:$0xff] (!%p192_p9)   ;;  %vm273_vm0 = vcmask (!%p192_p9), 261120   ;;  %vm425_vm1 = vcmask (!%p192_p9), 523264   ;;  %v913_v28 = vmov (!%p192_p9), 0  }
   0xe   : > { %195 = sbr.rel (%p192_p9) target bundleno = 544 (0x220), region = 40  ;;  %p220_p10 = scmp.lt.s32.totalorder (!%p192_p9), %s637_s7, 31  ;;  %700 = vmatprep.subr.bf16.mxu0 (!%p192_p9), %v847_v0  ;;  %v411_v26 = vld [vmem:[%s1140_s3] sm:$0xff] (!%p192_p9)  ;;  %846 = vset.pattern.permute.xlu0 (!%p192_p9), %v913_v28  ;;  %v414_v29 = vld [vmem:[%s1141_s4 + $0x8] sm:$0xff] (!%p192_p9)  ;;  %vm1047_vm2 = vmpackc.low (!%p192_p9), %vm425_vm1, %vm425_vm1 }
   0xf   : > { %701 = vmatpush3.bf16.msra.mxu0 (!%p192_p9), %v847_v0  ;;  %752 = vmatprep.mubr.msk.f32.mxu1 (!%p192_p9), %vm425_vm1, %v411_v26  ;;  %v413_v27 = vld [vmem:[%s1141_s4] sm:$0xff] (!%p192_p9)  ;;  %s216_s8 = sand.u32 (!%p192_p9), 1, %s903_s19   ;;  %s669_s12 = sshll.u32 (!%p192_p9), %s969_s22, 7 }
  0x10   : > { %702 = vmatprep.subr.bf16.mxu0 (!%p192_p9), %v848_v1  ;;  %417 = vperm.xlu0 (!%p192_p9), %846, %v413_v27   ;;  %v639_v30 = vld [vmem:[%s1139_s2] ss:$0 sm:$0xff] (!%p192_p9)  ;;  %s636_s9 = sshll.u32 (!%p192_p9), %s216_s8, 4  ;;  %s1094_s15 = scalar_lea.hbm (!%p192_p9), %s1142_s5, %s669_s12 }
  0x11   : > { %s1096_s16 = scalar_lea.sflag (!%p192_p9), [#allocation3], %s216_s8  ;;  %s914_s17 = smov (!%p192_p9), [#allocation2]  }
  0x12   : > { %s853_s23 = sshll.u32 (!%p192_p9), %s914_s17, 4  ;;  %s854_s23 = int_to_ptr.vmem [resolvable:$false] %s853_s23 }
  0x13   : > { %703 = vmatpush3.bf16.msra.mxu0 (!%p192_p9), %v848_v1  ;;  %s855_s25 = scalar_lea.vmem (!%p192_p9), %s854_s23, 512 }
  0x14   : > { %422 = vperm.xlu0 (!%p192_p9), %846, %v414_v29  }
  0x15   : > { %s1152_s7 = smov (!%p220_p10, %s637_s7), 31 }
  0x16   : > { %s638_s10 = sshll.u32 %s1152_s7, 3 }
  0x17   : > { %s1006_s13 = scalar_lea.vmem %s1137_s0, %s638_s10  ;;  %s218_s10 = scalar_lea.vmem [#allocation2], %s636_s9 }
  0x18   : > { %v226_v2 = vld [vmem:[%s1006_s13] sm:$0xff]  ;;  %v227_v3 = vld [vmem:[%s1006_s13 + $0x8] sm:$0xff]  ;;  %v228_v4 = vld [vmem:[%s1006_s13 + $0x10] sm:$0xff]  ;;  %s570_s11 = sshll.u32 %s218_s10, 4  ;;  %s1089_s11 = int_to_ptr.vmem [resolvable:$true] %s570_s11 }
  0x19   : > { %v242_v5 = vpack.c.bf16 %v227_v3, %v226_v2  ;;  %v229_v6 = vld [vmem:[%s1006_s13 + $0x18] sm:$0xff]  ;;  %v230_v7 = vld [vmem:[%s1006_s13 + $0x20] sm:$0xff]  ;;  %v231_v8 = vld [vmem:[%s1006_s13 + $0x28] sm:$0xff]  ;;  %s849_s22 = scalar_lea.vmem %s1089_s11, 256  ;;  %p856_p0 = scmp.lt.s32.totalorder %s1089_s11, %s854_s23 }
  0x1a   : > { %v243_v9 = vpack.c.bf16 %v229_v6, %v228_v4  ;;  %v244_v10 = vpack.c.bf16 %v231_v8, %v230_v7  ;;  %v232_v11 = vld [vmem:[%s1006_s13 + $0x30] sm:$0xff]  ;;  %v233_v12 = vld [vmem:[%s1006_s13 + $0x38] sm:$0xff]  ;;  %v234_v13 = vld [vmem:[%s1006_s13 + $0x40] sm:$0xff]  ;;  %p850_p11 = scmp.ne.s32.totalorder %s1089_s11, %s849_s22  ;;  %p857_p1 = scmp.lt.s32.totalorder %s855_s25, %s849_s22 }
  0x1b   : > { %704 = vmatprep.mubr.msk.bf16.mxu0 %vm273_vm0, %v242_v5  ;;  %v235_v14 = vld [vmem:[%s1006_s13 + $0x48] sm:$0xff]  ;;  %v245_v15 = vpack.c.bf16 %v233_v12, %v232_v11  ;;  %v236_v17 = vld [vmem:[%s1006_s13 + $0x50] sm:$0xff]  ;;  %v237_v18 = vld [vmem:[%s1006_s13 + $0x58] sm:$0xff] }
  0x1c   : > { %705 = vmatmul.mubr.msk.bf16.vlgmr.msra.gmra.mrb[0].mxu0 %vm273_vm0, %v243_v9  ;;  %v246_v16 = vpack.c.bf16 %v235_v14, %v234_v13  ;;  %v238_v19 = vld [vmem:[%s1006_s13 + $0x60] sm:$0xff]  ;;  %v239_v20 = vld [vmem:[%s1006_s13 + $0x68] sm:$0xff]  ;;  %v247_v21 = vpack.c.bf16 %v237_v18, %v236_v17  ;;  %v240_v23 = vld [vmem:[%s1006_s13 + $0x70] sm:$0xff]  ;;  %p851_p12 = pnand %p850_p11, %p986_p5  ;;  %p858_p2 = por %p857_p1, %p856_p0 }
  0x1d   : > { %708 = vmatprep.mubr.msk.bf16.mxu0 %vm273_vm0, %v244_v10  ;;  %v248_v22 = vpack.c.bf16 %v239_v20, %v238_v19  ;;  %v241_v24 = vld [vmem:[%s1006_s13 + $0x78] sm:$0xff] }
  0x1e   : > { %v249_v25 = vpack.c.bf16 %v241_v24, %v240_v23  ;;  %v412_v24 = vld [vmem:[%s1140_s3 + $0x8] sm:$0xff]  ;;  %p852_p13 = pneg %p851_p12 }
  0x20   : > { %p859_p3 = pnand %p858_p2, %p852_p13 }
  0x24   : > { %709 = vmatmul.mubr.msk.bf16.gmra.mrb[4].mxu0 %vm273_vm0, %v245_v15 }
  0x25   : > { %712 = vmatprep.mubr.msk.bf16.mxu0 %vm273_vm0, %v246_v16 }
  0x2c   : > { %713 = vmatmul.mubr.msk.bf16.gmra.mrb[8].mxu0 %vm273_vm0, %v247_v21 }
  0x2d   : > { %716 = vmatprep.mubr.msk.bf16.mxu0 %vm273_vm0, %v248_v22 }
  0x34   : > { %717 = vmatmul.mubr.msk.bf16.gmra.mrb[12].mxu0 %vm273_vm0, %v249_v25 }
  0x8f   : > { %v418_v25 = vpop.permute.xlu0 %417 }
  0x93   : > { %v423_v26 = vpop.permute.xlu0 %422 }
  0xef   : > { %v706_v31 = vpop.f32.mrb[0].mxu0 }
  0xf0   : > { %v341_v32 = vadd.f32 %v706_v31, %v639_v30  ;;  %v332_v33 = vpop.f32.mrb[1].mxu0 }
  0xf1   : > { %v333_v34 = vadd.f32 %v639_v30, %v332_v33  ;;  %v707_v35 = vpop.f32.mrb[2].mxu0 }
  0xf2   : > { %v344_v36 = vadd.f32 %v707_v35, %v639_v30  ;;  %v335_v37 = vpop.f32.mrb[3].mxu0  ;;  %v397_v39 = vmax.f32 %v341_v32, 0.0 }
  0xf3   : > { %v336_v38 = vadd.f32 %v639_v30, %v335_v37  ;;  %v395_v41 = vmax.f32 %v333_v34, 0.0 }
  0xf4   : > { %v398_v40 = vmax.f32 %v344_v36, 0.0 }
  0xf5   : > { %v396_v42 = vmax.f32 %v336_v38, 0.0 }
  0xf6   : > { %v761_v43 = vpack.c.bf16 %v398_v40, %v397_v39 }
  0xf7   : > { %v755_v45 = vpack.c.bf16 %v396_v42, %v395_v41  ;;  %v710_v46 = vpop.f32.mrb[4].mxu0 }
  0xf8   : > { %v357_v47 = vadd.f32 %v710_v46, %v639_v30  ;;  %v348_v48 = vpop.f32.mrb[5].mxu0 }
  0xf9   : > { %757 = vmatprep.subr.msk.bf16.mxu1 %vm1047_vm2, %v755_v45  ;;  %v349_v49 = vadd.f32 %v639_v30, %v348_v48  ;;  %v711_v50 = vpop.f32.mrb[6].mxu0 }
  0xfa   : > { %760 = vmatpush3.bf16.xpose.msk.msra.mxu1 %vm1047_vm2, %v755_v45  ;;  %v401_v51 = vmax.f32 %v357_v47, 0.0  ;;  %v360_v52 = vadd.f32 %v711_v50, %v639_v30  ;;  %v351_v53 = vpop.f32.mrb[7].mxu0 }
  0xfb   : > { %763 = vmatprep.subr.msk.bf16.mxu1 %vm1047_vm2, %v761_v43  ;;  %v399_v54 = vmax.f32 %v349_v49, 0.0  ;;  %v352_v55 = vadd.f32 %v639_v30, %v351_v53 }
  0xfc   : > { %v402_v56 = vmax.f32 %v360_v52, 0.0 }
  0xfd   : > { %v400_v57 = vmax.f32 %v352_v55, 0.0 }
  0xfe   : > { %v773_v58 = vpack.c.bf16 %v402_v56, %v401_v51 }
  0xff   : > { %v767_v59 = vpack.c.bf16 %v400_v57, %v399_v54  ;;  %v714_v60 = vpop.f32.mrb[8].mxu0 }
 0x100   : > { %v373_v61 = vadd.f32 %v714_v60, %v639_v30  ;;  %v364_v62 = vpop.f32.mrb[9].mxu0 }
 0x101   : > { %v365_v63 = vadd.f32 %v639_v30, %v364_v62  ;;  %v715_v0 = vpop.f32.mrb[10].mxu0 }
 0x102   : > { %766 = vmatpush3.bf16.xpose.msk.msra.mxu1 %vm1047_vm2, %v761_v43  ;;  %v405_v1 = vmax.f32 %v373_v61, 0.0  ;;  %v376_v2 = vadd.f32 %v715_v0, %v639_v30  ;;  %v367_v3 = vpop.f32.mrb[11].mxu0 }
 0x103   : > { %769 = vmatprep.subr.msk.bf16.mxu1 %vm1047_vm2, %v767_v59  ;;  %v403_v4 = vmax.f32 %v365_v63, 0.0  ;;  %v368_v5 = vadd.f32 %v639_v30, %v367_v3 }
 0x104   : > { %v406_v6 = vmax.f32 %v376_v2, 0.0 }
 0x105   : > { %v404_v7 = vmax.f32 %v368_v5, 0.0 }
 0x106   : > { %v785_v8 = vpack.c.bf16 %v406_v6, %v405_v1 }
 0x107   : > { %v779_v9 = vpack.c.bf16 %v404_v7, %v403_v4  ;;  %v718_v10 = vpop.f32.mrb[12].mxu0 }
 0x108   : > { %v389_v11 = vadd.f32 %v718_v10, %v639_v30  ;;  %v380_v12 = vpop.f32.mrb[13].mxu0 }
 0x109   : > { %v381_v13 = vadd.f32 %v639_v30, %v380_v12  ;;  %v719_v14 = vpop.f32.mrb[14].mxu0 }
 0x10a   : > { %772 = vmatpush3.bf16.xpose.msk.msra.mxu1 %vm1047_vm2, %v767_v59  ;;  %v409_v15 = vmax.f32 %v389_v11, 0.0  ;;  %v392_v16 = vadd.f32 %v719_v14, %v639_v30  ;;  %v383_v17 = vpop.f32.mrb[15].mxu0 }
 0x10b   : > { %775 = vmatprep.subr.msk.bf16.mxu1 %vm1047_vm2, %v773_v58  ;;  %v407_v18 = vmax.f32 %v381_v13, 0.0  ;;  %v384_v19 = vadd.f32 %v639_v30, %v383_v17 }
 0x10c   : > { %v410_v20 = vmax.f32 %v392_v16, 0.0 }
 0x10d   : > { %v408_v21 = vmax.f32 %v384_v19, 0.0 }
 0x10e   : > { %v797_v22 = vpack.c.bf16 %v410_v20, %v409_v15 }
 0x10f   : > { %v791_v23 = vpack.c.bf16 %v408_v21, %v407_v18 }
 0x112   : > { %778 = vmatpush3.bf16.xpose.msk.msra.mxu1 %vm1047_vm2, %v773_v58 }
 0x113   : > { %781 = vmatprep.subr.msk.bf16.mxu1 %vm1047_vm2, %v779_v9 }
 0x11a   : > { %784 = vmatpush3.bf16.xpose.msk.msra.mxu1 %vm1047_vm2, %v779_v9 }
 0x11b   : > { %787 = vmatprep.subr.msk.bf16.mxu1 %vm1047_vm2, %v785_v8 }
 0x122   : > { %790 = vmatpush3.bf16.xpose.msk.msra.mxu1 %vm1047_vm2, %v785_v8 }
 0x123   : > { %793 = vmatprep.subr.msk.bf16.mxu1 %vm1047_vm2, %v791_v23 }
 0x12a   : > { %796 = vmatpush3.bf16.xpose.msk.msra.mxu1 %vm1047_vm2, %v791_v23 }
 0x12b   : > { %799 = vmatprep.subr.msk.bf16.mxu1 %vm1047_vm2, %v797_v22 }
 0x132   : > { %802 = vmatpush3.bf16.xpose.msk.msra.mxu1 %vm1047_vm2, %v797_v22 }
 0x139   : > { %753 = vmatmul.mubr.msk.f32.vlgmr.msra.gmra.mrb[0].mxu1 %vm425_vm1, %v412_v24 }
 0x20c   : > { %v754_v27 = vpop.f32.mrb[0].mxu1 }
 0x20d   : > { %v552_v28 = vadd.f32 %v754_v27, %v423_v26  ;;  %v546_v29 = vpop.f32.mrb[1].mxu1 }
 0x20e   : > { %v547_v30 = vadd.f32 %v546_v29, %v418_v25 }
 0x20f   : > { %556 = vst [vmem:[%s218_s10 + $0x8] sm:$0xff] %v552_v28 }
 0x210   : > { %555 = vst [vmem:[%s218_s10] sm:$0xff] %v547_v30 }
 0x211   : > { %862 = shalt.err (!%p859_p3)
}
 0x212   : > { %s863_s26 = scalar_lea.hbm %s1094_s15, 256  ;;  %s867_s7 = scalar_lea.hbm %s1142_s5, 512 }
 0x213   : > { %p864_p4 = scmp.ne.s32.totalorder %s1094_s15, %s863_s26  ;;  %p868_p9 = scmp.lt.u32.totalorder %s1094_s15, %s1142_s5 }
 0x214   : > { %p869_p10 = scmp.lt.u32.totalorder %s867_s7, %s863_s26  ;;  %p871_p12 = scmp.lt.u32.totalorder %s863_s26, %s1094_s15 }
 0x215   : > { %p865_p7 = pnand %p864_p4, %p986_p5 }
 0x216   : > { %p870_p11 = por %p869_p10, %p868_p9 }
 0x217   : > { %p866_p8 = pneg %p865_p7 }
 0x218   : > { %p872_p13 = por %p871_p12, %p870_p11 }
 0x21a   : > { %p873_p0 = pnand %p872_p13, %p866_p8 }
 0x21c   : > { %876 = shalt.err (!%p873_p0)
}
 0x21d   : > { %s915_s10 = smov 128   ;;  %s916_s12 = smov 256  }
 0x21e   : > { %s917_s13 = smov 8  }
 0x21f   : > { %803 = dma.vmem_to_hbm [thread:$0]  (%p986_p5), %s1089_s11, 256, %s1094_s15, %s1096_s16, %s915_s10, %s916_s12, %s917_s13  }
 0x220 PF: > { %p809_p1 = scmp.ge.s32.totalorder %s911_s21, 2  ;;  %s585_s14 = sand.u32 1, %s899_s18  }
 0x221   : > { %s586_s22 = scalar_lea.sflag [#allocation3], %s585_s14 }
 0x222   : > { %p806_p2 = pnand %p809_p1, %p990_p6 }
 0x224   : > { %894 = dma.done.wait (!%p806_p2), %s586_s22, 256  }
 0x225   : > { %896 = vsyncadd (!%p806_p2), %s586_s22, 4294967040  ;;  %p15_p3 = scmp.ge.s32.totalorder %s973_s24, 4   ;;  %s1147_s18 = smov %s903_s19 }
 0x226   : > { %s1148_s19 = smov %s907_s20  ;;  %s1149_s20 = smov %s984_s27 }
 0x227   : > { %s1150_s21 = smov %s973_s24  ;;  %17 = sbr.rel (!%p15_p3) target bundleno = 3 (0x3), region = 75 }
 0x22e   :  { %591 = vsyncpa [#allocation3], 1 }
 0x22f   :  { %593 = vsyncpa [#allocation3 + $0x1], 1 }

</bundles_post_ra>
